<compile_context>
chip_gen: v5e
topology: v5e:2x2
jax: 0.10.0
libtpu: 0.0.40
codegen_flags: <defaults>
</compile_context>

<pallas_src>
import functools
import math

import jax
import jax.numpy as jnp
from jax.experimental import pallas as pl
from jax.experimental.pallas import tpu as pltpu


# ----------------------------------------------------------------------------
# helpers
# ----------------------------------------------------------------------------
def _pick_tile(dim, target, aligns=(128, 8)):
    """Largest tile <= target that divides `dim`, preferring the leading
    alignment (128 keeps MXU/lane tiles full); falls back to the full dim
    (full-extent blocks always satisfy the (8,128) rule)."""
    if dim <= target:
        return dim
    for a in aligns:
        t = (min(target, dim) // a) * a
        while t >= a:
            if dim % t == 0:
                return t
            t -= a
    # TODO(synk): pad + pl.cdiv grid + masking for shapes with no aligned
    # divisor instead of a full-extent fallback (VMEM risk on v7x).
    return dim


# ----------------------------------------------------------------------------
# Tiled linear projection:  out = x @ w    (w pre-transposed to (K, N))
# ----------------------------------------------------------------------------
def _linear_kernel(x_ref, w_ref, o_ref, acc_ref):
    @pl.when(pl.program_id(2) == 0)
    def _init():
        acc_ref[...] = jnp.zeros(acc_ref.shape, dtype=jnp.float32)

    # MXU is fed the storage dtype (bf16 in production); f32 accumulation.
    acc_ref[...] += jnp.dot(x_ref[...], w_ref[...],
                            preferred_element_type=jnp.float32)

    @pl.when(pl.program_id(2) == pl.num_programs(2) - 1)
    def _store():
        o_ref[...] = acc_ref[...].astype(o_ref.dtype)


def linear(x2d, w, *, tm_target=512, tn_target=256, tk_target=512):
    """x2d: (M, K), w: (K, N) (pre-transposed at model load) -> (M, N)."""
    M, K = x2d.shape
    K2, N = w.shape
    assert K == K2
    tm = _pick_tile(M, tm_target, aligns=(8,))
    tn = _pick_tile(N, tn_target, aligns=(128,))
    tk = _pick_tile(K, tk_target, aligns=(128,))
    grid = (M // tm, N // tn, K // tk)
    return pl.pallas_call(
        _linear_kernel,
        out_shape=jax.ShapeDtypeStruct((M, N), x2d.dtype),
        grid=grid,
        in_specs=[
            pl.BlockSpec((tm, tk), lambda i, j, k: (i, k)),
            pl.BlockSpec((tk, tn), lambda i, j, k: (k, j)),
        ],
        out_specs=pl.BlockSpec((tm, tn), lambda i, j, k: (i, j)),
        scratch_shapes=[pltpu.VMEM((tm, tn), jnp.float32)],
        compiler_params=pltpu.CompilerParams(
            dimension_semantics=("parallel", "parallel", "arbitrary")),
    )(x2d, w)


# ----------------------------------------------------------------------------
# RoPE kernel: rotate Q (pre-scaled by 1/sqrt(D)) and K once per token.
#   q : (B, S, Hq*D)   k : (B, S, Hkv*D)   cos/sin_signed : (S, D)
# ----------------------------------------------------------------------------
def _rope_kernel(q_ref, k_ref, cos_ref, sin_ref, qo_ref, ko_ref,
                 *, n_q_heads, n_kv_heads, head_dim, scale, use_roll):
    D = head_dim

    def swap_halves(x):
        # rotate_half without negation; the sign is pre-folded into `sin`.
        if use_roll:
            return pltpu.roll(x, shift=D // 2, axis=1)
        return jnp.concatenate([x[:, D // 2:], x[:, :D // 2]], axis=-1)

    cos = cos_ref[...].astype(jnp.float32)
    sin = sin_ref[...].astype(jnp.float32)
    cos_q = cos * scale          # fold 1/sqrt(D) into the Q tables, once per tile
    sin_q = sin * scale

    for h in range(n_q_heads):
        qh = q_ref[0, :, h * D:(h + 1) * D].astype(jnp.float32)
        qo_ref[0, :, h * D:(h + 1) * D] = (
            qh * cos_q + swap_halves(qh) * sin_q).astype(qo_ref.dtype)
    for h in range(n_kv_heads):
        kh = k_ref[0, :, h * D:(h + 1) * D].astype(jnp.float32)
        ko_ref[0, :, h * D:(h + 1) * D] = (
            kh * cos + swap_halves(kh) * sin).astype(ko_ref.dtype)


def apply_rope(q, k, cos, sin_signed, scale, n_q_heads, n_kv_heads,
               *, ts_target=512):
    B, S, QH = q.shape
    KVH = k.shape[-1]
    D = QH // n_q_heads
    ts = _pick_tile(S, ts_target)
    kernel = functools.partial(
        _rope_kernel, n_q_heads=n_q_heads, n_kv_heads=n_kv_heads,
        head_dim=D, scale=scale, use_roll=(D % 128 == 0))
    return pl.pallas_call(
        kernel,
        out_shape=(jax.ShapeDtypeStruct((B, S, QH), q.dtype),
                   jax.ShapeDtypeStruct((B, S, KVH), k.dtype)),
        grid=(B, S // ts),
        in_specs=[
            pl.BlockSpec((1, ts, QH), lambda b, si: (b, si, 0)),
            pl.BlockSpec((1, ts, KVH), lambda b, si: (b, si, 0)),
            pl.BlockSpec((ts, D), lambda b, si: (si, 0)),
            pl.BlockSpec((ts, D), lambda b, si: (si, 0)),
        ],
        out_specs=(pl.BlockSpec((1, ts, QH), lambda b, si: (b, si, 0)),
                   pl.BlockSpec((1, ts, KVH), lambda b, si: (b, si, 0))),
        compiler_params=pltpu.CompilerParams(
            dimension_semantics=("parallel", "parallel")),
    )(q, k, cos, sin_signed)


# ----------------------------------------------------------------------------
# Causal flash attention on pre-rotated, pre-scaled Q/K.
# Grid step = (batch b, q block qi, kv block ki); all heads of a KV group are
# stacked along sublanes so each group does ONE QK^T and ONE PV matmul.
# ----------------------------------------------------------------------------
def _flash_kernel(q_ref, k_ref, v_ref, o_ref, qs_ref, m_ref, l_ref, acc_ref,
                  *, n_q_heads, n_kv_heads, head_dim, tq, tkv, mask_value):
    qi = pl.program_id(1)
    ki = pl.program_id(2)
    nk = pl.num_programs(2)
    n_rep = n_q_heads // n_kv_heads
    D = head_dim

    @pl.when(ki == 0)
    def _init():
        m_ref[...] = jnp.full(m_ref.shape, mask_value, dtype=jnp.float32)
        l_ref[...] = jnp.zeros(l_ref.shape, dtype=jnp.float32)
        acc_ref[...] = jnp.zeros(acc_ref.shape, dtype=jnp.float32)
        # Stack each KV group's query heads along sublanes ONCE per q block
        # (not per kv block): (n_rep*tq, D) per kv head.
        for hk in range(n_kv_heads):
            for r in range(n_rep):
                h = hk * n_rep + r
                qs_ref[hk, r * tq:(r + 1) * tq, :] = q_ref[0, :, h * D:(h + 1) * D]

    # causal block relevance: does this kv block overlap qi's causal region?
    needed = ki * tkv <= (qi + 1) * tq - 1

    @pl.when(needed)
    def _compute():
        # (tq, tkv) causal mask, replicated across the stacked group rows.
        q_pos = qi * tq + jax.lax.broadcasted_iota(jnp.int32, (tq, tkv), 0)
        k_pos = ki * tkv + jax.lax.broadcasted_iota(jnp.int32, (tq, tkv), 1)
        causal = jnp.tile(k_pos <= q_pos, (n_rep, 1))          # (n_rep*tq, tkv)

        for hk in range(n_kv_heads):
            kh = k_ref[0, :, hk * D:(hk + 1) * D]              # (tkv, D)
            vh = v_ref[0, :, hk * D:(hk + 1) * D]              # (tkv, D)
            qg = qs_ref[hk]                                    # (n_rep*tq, D)

            s = jax.lax.dot_general(                           # (n_rep*tq, tkv)
                qg, kh, dimension_numbers=(((1,), (1,)), ((), ())),
                preferred_element_type=jnp.float32)
            s = jnp.where(causal, s, mask_value)

            m_prev = m_ref[hk]                                 # (n_rep*tq, 1)
            m_new = jnp.maximum(m_prev, jnp.max(s, axis=-1, keepdims=True))
            alpha = jnp.exp(m_prev - m_new)
            p = jnp.exp(s - m_new)
            l_ref[hk] = alpha * l_ref[hk] + jnp.sum(p, axis=-1, keepdims=True)
            pv = jnp.dot(p.astype(vh.dtype), vh,               # bf16 MXU feed
                         preferred_element_type=jnp.float32)
            acc_ref[hk] = alpha * acc_ref[hk] + pv
            m_ref[hk] = m_new

    @pl.when(ki == nk - 1)
    def _finalize():
        # Exact reciprocal (approx EUP reciprocal adds ~1e-3 rel err) and
        # per-head stores straight from scratch (no big concat temp).
        for hk in range(n_kv_heads):
            inv_l = 1.0 / l_ref[hk]                            # (n_rep*tq, 1)
            out = acc_ref[hk] * inv_l                          # (n_rep*tq, D)
            for r in range(n_rep):
                h = hk * n_rep + r
                o_ref[0, :, h * D:(h + 1) * D] = (
                    out[r * tq:(r + 1) * tq, :].astype(o_ref.dtype))


def flash_attention(q, k, v, n_q_heads, n_kv_heads,
                    *, tq_target=256, tkv_target=256):
    """q (rotated+scaled): (B,S,Hq*D), k (rotated)/v: (B,S,Hkv*D) -> (B,S,Hq*D)."""
    B, S, QH = q.shape
    KVH = k.shape[-1]
    D = QH // n_q_heads
    n_rep = n_q_heads // n_kv_heads

    tq = _pick_tile(S, tq_target)
    tkv = _pick_tile(S, tkv_target)
    nq, nk = S // tq, S // tkv

    def _kv_idx(qi, ki):
        # clamp so fully-masked (skipped) kv blocks re-point at the last needed
        # block -> skipped steps cost neither compute nor DMA.
        last_needed = ((qi + 1) * tq - 1) // tkv
        return jnp.minimum(ki, last_needed)

    kernel = functools.partial(
        _flash_kernel, n_q_heads=n_q_heads, n_kv_heads=n_kv_heads,
        head_dim=D, tq=tq, tkv=tkv, mask_value=-1e30)

    return pl.pallas_call(
        kernel,
        out_shape=jax.ShapeDtypeStruct((B, S, QH), q.dtype),
        grid=(B, nq, nk),
        in_specs=[
            pl.BlockSpec((1, tq, QH), lambda b, qi, ki: (b, qi, 0)),
            pl.BlockSpec((1, tkv, KVH), lambda b, qi, ki: (b, _kv_idx(qi, ki), 0)),
            pl.BlockSpec((1, tkv, KVH), lambda b, qi, ki: (b, _kv_idx(qi, ki), 0)),
        ],
        out_specs=pl.BlockSpec((1, tq, QH), lambda b, qi, ki: (b, qi, 0)),
        scratch_shapes=[
            pltpu.VMEM((n_kv_heads, n_rep * tq, D), q.dtype),      # stacked Q
            pltpu.VMEM((n_kv_heads, n_rep * tq, 1), jnp.float32),  # running max
            pltpu.VMEM((n_kv_heads, n_rep * tq, 1), jnp.float32),  # running sum
            pltpu.VMEM((n_kv_heads, n_rep * tq, D), jnp.float32),  # output acc
        ],
        compiler_params=pltpu.CompilerParams(
            dimension_semantics=("parallel", "parallel", "arbitrary")),
    )(q, k, v)


# ----------------------------------------------------------------------------
# Full Attention.forward (eval mode, no cache, no attention_mask)
# Weights are pre-transposed to (in_features, out_features) at model load.
# ----------------------------------------------------------------------------
def attention_forward(x, cos, sin, wq_t, wk_t, wv_t, wo_t, n_heads, n_kv_heads,
                      *, tq_target=256, tkv_target=256,
                      lin_tm=512, lin_tn=256, lin_tk=512):
    B, S, H = x.shape
    D = H // n_heads
    scale = 1.0 / math.sqrt(D)

    x2d = x.reshape(B * S, H)
    q = linear(x2d, wq_t, tm_target=lin_tm, tn_target=lin_tn, tk_target=lin_tk)
    k = linear(x2d, wk_t, tm_target=lin_tm, tn_target=lin_tn, tk_target=lin_tk)
    v = linear(x2d, wv_t, tm_target=lin_tm, tn_target=lin_tn, tk_target=lin_tk)
    q = q.reshape(B, S, n_heads * D)
    k = k.reshape(B, S, n_kv_heads * D)
    v = v.reshape(B, S, n_kv_heads * D)

    # sign-folded sin table (rotate_half negation folded into the table)
    sign = jnp.concatenate([-jnp.ones((D // 2,), cos.dtype),
                            jnp.ones((D // 2,), cos.dtype)])
    sin_signed = sin * sign[None, :]

    # RoPE once per token (Q additionally pre-scaled by 1/sqrt(D)).
    q, k = apply_rope(q, k, cos, sin_signed, scale, n_heads, n_kv_heads)

    attn = flash_attention(q, k, v, n_heads, n_kv_heads,
                           tq_target=tq_target, tkv_target=tkv_target)

    out = linear(attn.reshape(B * S, n_heads * D), wo_t,
                 tm_target=lin_tm, tn_target=lin_tn, tk_target=lin_tk)
    return out.reshape(B, S, H)


# ----------------------------------------------------------------------------
# Pure-JAX reference (mirrors the PyTorch forward, eval mode, f32 math).
# Weights in torch (out_features, in_features) layout.
# ----------------------------------------------------------------------------
def attention_reference(x, cos, sin, wq, wk, wv, wo, n_heads, n_kv_heads):
    x = x.astype(jnp.float32)
    wq = wq.astype(jnp.float32)
    wk = wk.astype(jnp.float32)
    wv = wv.astype(jnp.float32)
    wo = wo.astype(jnp.float32)
    cos = cos.astype(jnp.float32)
    sin = sin.astype(jnp.float32)

    B, S, H = x.shape
    D = H // n_heads
    n_rep = n_heads // n_kv_heads

    xq = (x @ wq.T).reshape(B, S, n_heads, D)
    xk = (x @ wk.T).reshape(B, S, n_kv_heads, D)
    xv = (x @ wv.T).reshape(B, S, n_kv_heads, D)

    def rotate_half(t):
        return jnp.concatenate([-t[..., D // 2:], t[..., :D // 2]], axis=-1)

    c = cos[None, :, None, :]
    s = sin[None, :, None, :]
    xq = xq * c + rotate_half(xq) * s
    xk = xk * c + rotate_half(xk) * s

    xk = jnp.repeat(xk, n_rep, axis=2)
    xv = jnp.repeat(xv, n_rep, axis=2)

    q = jnp.transpose(xq, (0, 2, 1, 3))
    k = jnp.transpose(xk, (0, 2, 1, 3))
    v = jnp.transpose(xv, (0, 2, 1, 3))

    scores = jnp.einsum("bhqd,bhkd->bhqk", q, k) / math.sqrt(D)
    mask = jnp.triu(jnp.full((S, S), -jnp.inf), k=1)
    scores = scores + mask[None, None]
    p = jax.nn.softmax(scores, axis=-1)
    out = jnp.einsum("bhqk,bhkd->bhqd", p, v)
    out = jnp.transpose(out, (0, 2, 1, 3)).reshape(B, S, H)
    return out @ wo.T


# ----------------------------------------------------------------------------
def make_rope_tables(seq_len, head_dim, theta=1e6):
    inv_freq = 1.0 / (theta ** (jnp.arange(0, head_dim, 2, dtype=jnp.float32) / head_dim))
    t = jnp.arange(seq_len, dtype=jnp.float32)
    freqs = jnp.outer(t, inv_freq)                        # (S, D/2)
    cos = jnp.concatenate([jnp.cos(freqs), jnp.cos(freqs)], axis=-1)
    sin = jnp.concatenate([jnp.sin(freqs), jnp.sin(freqs)], axis=-1)
    return cos, sin


def _run_case(batch, seq_len, hidden_size, n_heads, n_kv_heads,
              dtype=jnp.float32, rtol=2e-3, atol=2e-3, **kw):
    head_dim = hidden_size // n_heads
    key = jax.random.PRNGKey(0)
    kx, kq, kk, kv_, ko = jax.random.split(key, 5)

    x = jax.random.normal(kx, (batch, seq_len, hidden_size), dtype=jnp.float32)
    wq = jax.random.normal(kq, (n_heads * head_dim, hidden_size), jnp.float32) * 0.05
    wk = jax.random.normal(kk, (n_kv_heads * head_dim, hidden_size), jnp.float32) * 0.05
    wv = jax.random.normal(kv_, (n_kv_heads * head_dim, hidden_size), jnp.float32) * 0.05
    wo = jax.random.normal(ko, (hidden_size, n_heads * head_dim), jnp.float32) * 0.05
    cos, sin = make_rope_tables(seq_len, head_dim)

    # storage dtype (bf16 in production: feeds the MXU bf16 end-to-end)
    x_d = x.astype(dtype)
    wq_d, wk_d, wv_d, wo_d = (w.astype(dtype) for w in (wq, wk, wv, wo))

    # one-time "model load" transpose to (in_features, out_features)
    wq_t, wk_t, wv_t, wo_t = wq_d.T, wk_d.T, wv_d.T, wo_d.T

    out = attention_forward(x_d, cos, sin, wq_t, wk_t, wv_t, wo_t,
                            n_heads, n_kv_heads, **kw)
    out = jax.block_until_ready(out)
    ref = attention_reference(x_d, cos, sin, wq_d, wk_d, wv_d, wo_d,
                              n_heads, n_kv_heads)

    assert out.shape == (batch, seq_len, hidden_size)
    out_f32 = out.astype(jnp.float32)
    err = jnp.max(jnp.abs(out_f32 - ref))
    assert jnp.allclose(out_f32, ref, rtol=rtol, atol=atol), \
        f"mismatch vs reference (max err {err}, rtol={rtol}, atol={atol})"


if __name__ == "__main__":
    # Case A: toy MiniMind-like config, fp32, strict tolerance
    # (single-block path; kernel math is exact-fp32 here).
    _run_case(batch=2, seq_len=8, hidden_size=32, n_heads=4, n_kv_heads=2,
              dtype=jnp.float32, rtol=2e-3, atol=2e-3)

    # Case B: bf16 storage (production MXU path) with small tile overrides to
    # exercise the multi-block flash loop (causal block skipping, grouped-head
    # matmuls) and the tiled/accumulated linear path.
    _run_case(batch=2, seq_len=32, hidden_size=256, n_heads=4, n_kv_heads=2,
              dtype=jnp.bfloat16, rtol=6e-2, atol=6e-2,
              tq_target=16, tkv_target=16, lin_tm=32, lin_tn=128, lin_tk=128)

    print("KERNEL_OK")
</pallas_src>

<mosaic_0001>
module attributes {stable_mosaic.version = 11 : i64} {
  func.func @_linear_kernel(%arg0: i32, %arg1: i32, %arg2: i32, %arg3: memref<16x32xf32, #tpu.memory_space<vmem>>, %arg4: memref<32x32xf32, #tpu.memory_space<vmem>>, %arg5: memref<16x32xf32, #tpu.memory_space<vmem>>, %arg6: memref<16x32xf32, #tpu.memory_space<vmem>>) attributes {dimension_semantics = [#tpu.dimension_semantics<parallel>, #tpu.dimension_semantics<parallel>, #tpu.dimension_semantics<arbitrary>], iteration_bounds = array<i64: 1, 1, 1>, scalar_prefetch = 0 : i64, scratch_operands = 1 : i64, tpu.core_type = #tpu.core_type<tc>, window_params = [{transform_indices = @transform_0, window_bounds = array<i64: 16, 32>}, {transform_indices = @transform_1, window_bounds = array<i64: 32, 32>}, {transform_indices = @transform_2, window_bounds = array<i64: 16, 32>}]} {
    %c0_i32 = arith.constant 0 : i32
    %0 = arith.cmpi eq, %arg2, %c0_i32 : i32
    %1 = arith.extui %0 : i1 to i32
    %c0_i32_0 = arith.constant 0 : i32
    %2 = arith.cmpi ne, %1, %c0_i32_0 : i32
    scf.if %2 {
      %cst_10 = arith.constant 0.000000e+00 : f32
      %12 = vector.broadcast %cst_10 : f32 to vector<16x32xf32>
      %c0_11 = arith.constant 0 : index
      %c0_12 = arith.constant 0 : index
      %13 = vector.load %arg6[%c0_11, %c0_12] : memref<16x32xf32, #tpu.memory_space<vmem>>, vector<16x32xf32>
      tpu.vector_store %arg6[%c0_11, %c0_12], %12 {strides = array<i32>} : memref<16x32xf32, #tpu.memory_space<vmem>>, vector<16x32xf32>,
    } else {
    }
    %c0 = arith.constant 0 : index
    %c0_1 = arith.constant 0 : index
    %3 = vector.load %arg6[%c0, %c0_1] : memref<16x32xf32, #tpu.memory_space<vmem>>, vector<16x32xf32>
    %c0_2 = arith.constant 0 : index
    %c0_3 = arith.constant 0 : index
    %4 = vector.load %arg3[%c0_2, %c0_3] : memref<16x32xf32, #tpu.memory_space<vmem>>, vector<16x32xf32>
    %c0_4 = arith.constant 0 : index
    %c0_5 = arith.constant 0 : index
    %5 = vector.load %arg4[%c0_4, %c0_5] : memref<32x32xf32, #tpu.memory_space<vmem>>, vector<32x32xf32>
    %cst = arith.constant dense<0.000000e+00> : vector<16x32xf32>
    %6 = tpu.matmul %4, %5, %cst {dimension_numbers = #tpu.dot_dimension_numbers<[1], [0], [0], [1], [0, 0, 1, 1], [], []>} : vector<16x32xf32>, vector<32x32xf32>, vector<16x32xf32> -> vector<16x32xf32>
    %7 = arith.addf %3, %6 : vector<16x32xf32>
    %c0_6 = arith.constant 0 : index
    %c0_7 = arith.constant 0 : index
    %8 = vector.load %arg6[%c0_6, %c0_7] : memref<16x32xf32, #tpu.memory_space<vmem>>, vector<16x32xf32>
    tpu.vector_store %arg6[%c0_6, %c0_7], %7 {strides = array<i32>} : memref<16x32xf32, #tpu.memory_space<vmem>>, vector<16x32xf32>,
    %c0_i32_8 = arith.constant 0 : i32
    %9 = arith.cmpi eq, %arg2, %c0_i32_8 : i32
    %10 = arith.extui %9 : i1 to i32
    %c0_i32_9 = arith.constant 0 : i32
    %11 = arith.cmpi ne, %10, %c0_i32_9 : i32
    scf.if %11 {
      %c0_10 = arith.constant 0 : index
      %c0_11 = arith.constant 0 : index
      %12 = vector.load %arg6[%c0_10, %c0_11] : memref<16x32xf32, #tpu.memory_space<vmem>>, vector<16x32xf32>
      %c0_12 = arith.constant 0 : index
      %c0_13 = arith.constant 0 : index
      %13 = vector.load %arg5[%c0_12, %c0_13] : memref<16x32xf32, #tpu.memory_space<vmem>>, vector<16x32xf32>
      tpu.vector_store %arg5[%c0_12, %c0_13], %12 {strides = array<i32>} : memref<16x32xf32, #tpu.memory_space<vmem>>, vector<16x32xf32>,
    } else {
    }
    return
  }
  func.func @transform_0(%arg0: i32, %arg1: i32, %arg2: i32) -> (i32, i32) {
    %c0_i32 = arith.constant 0 : i32
    return %arg0, %arg2 : i32, i32
  }
  func.func @transform_1(%arg0: i32, %arg1: i32, %arg2: i32) -> (i32, i32) {
    %c0_i32 = arith.constant 0 : i32
    return %arg2, %arg1 : i32, i32
  }
  func.func @transform_2(%arg0: i32, %arg1: i32, %arg2: i32) -> (i32, i32) {
    %c0_i32 = arith.constant 0 : i32
    return %arg0, %arg1 : i32, i32
  }
}

</mosaic_0001>

<bundles_post_ra>
// kernel: tpu_custom_call.1
= control target key start
LH: loop header
LB: loop body
LE: loop exit
PB: predicated region body
PF: predicated region fallthrough
CT: control target
= control target key end

     0   :  { %7 = vsyncpa [#allocation4], 0  ;;  %s257_s0 = inlined_call_operand.hbm [shape: f32[16,32], index: 0, kind: input, shape index: {}]   ;;  %s258_s1 = inlined_call_operand.hbm [shape: f32[32,32], index: 1, kind: input, shape index: {}]   ;;  %s259_s2 = inlined_call_operand.hbm [shape: f32[16,32], index: 2, kind: output, shape index: {}]  }
   0x1   :  { %8 = vsyncpa [#allocation7], 0 }
   0x2   :  { %9 = vsyncpa [#allocation5], 0  ;;  %s14_s11 = sshll.u32 %s257_s0, 4  ;;  %s210_s12 = smov [#allocation3]   ;;  %s15_s11 = int_to_ptr.hbm [resolvable:$true] %s14_s11 }
   0x3   :  { %s16_s13 = sshll.u32 %s210_s12, 4  ;;  %s27_s16 = sshll.u32 %s258_s1, 4  ;;  %s17_s13 = int_to_ptr.vmem [resolvable:$true] %s16_s13  ;;  %s28_s16 = int_to_ptr.hbm [resolvable:$true] %s27_s16 }
   0x4   :  { %s211_s17 = smov 128   ;;  %s212_s18 = smov 8  }
   0x5   :  { %22 = dma.hbm_to_vmem [thread:$0]  %s15_s11, 256, %s17_s13, [#allocation4], %s211_s17, %s211_s17, %s212_s18  }
   0x6   :  { %s213_s19 = smov [#allocation6]  }
   0x7   :  { %s29_s20 = sshll.u32 %s213_s19, 4  ;;  %s30_s20 = int_to_ptr.vmem [resolvable:$true] %s29_s20 }
   0x8   :  { %35 = dma.hbm_to_vmem [thread:$0]  %s28_s16, 512, %s30_s20, [#allocation7], %s211_s17, %s211_s17, %s212_s18  }
   0x9   :  { %204 = dma.done.wait [#allocation4], 256  }
   0xa   :  { %205 = vsyncadd [#allocation4], 4294967040 }
   0xb   :  { %206 = dma.done.wait [#allocation7], 512  }
   0xc   :  { %207 = vsyncadd [#allocation7], 4294966784  ;;  %vm48_vm0 = vcmask 261120   ;;  %v214_v0 = vmov 0.0   ;;  %v58_v1 = vld [vmem:[#allocation6 + $0x18] sm:$0xff]  ;;  %v57_v2 = vld [vmem:[#allocation6 + $0x10] sm:$0xff] }
   0xd   :  { %49 = vst.msk [vmem:[#allocation2] sm:$0xff] %vm48_vm0, %v214_v0  ;;  %78 = vmatpush.msra.mxu0 %v58_v1  ;;  %122 = vmatpush.msra.mxu1 %v58_v1  ;;  %v56_v3 = vld [vmem:[#allocation6 + $0x8] sm:$0xff]  ;;  %v55_v4 = vld [vmem:[#allocation6] sm:$0xff]  ;;  %v53_v5 = vld [vmem:[#allocation3] sm:$0xff]  ;;  %s215_s0 = smov [#allocation8]   ;;  %s106_s23 = sshll.u32 %s259_s2, 4  ;;  %s107_s23 = int_to_ptr.hbm [resolvable:$true] %s106_s23 }
   0xe   :  { %50 = vst.msk [vmem:[#allocation2 + $0x8] sm:$0xff] %vm48_vm0, %v214_v0  ;;  %v54_v6 = vld [vmem:[#allocation3 + $0x8] sm:$0xff]  ;;  %s104_s1 = sshll.u32 %s215_s0, 4  ;;  %s105_s1 = int_to_ptr.vmem [resolvable:$true] %s104_s1 }
   0xf   :  { %79 = vmatpush.msra.mxu0 %v57_v2  ;;  %123 = vmatpush.msra.mxu1 %v57_v2 }
  0x11   :  { %80 = vmatpush.msra.mxu0 %v56_v3  ;;  %124 = vmatpush.msra.mxu1 %v56_v3 }
  0x13   :  { %81 = vmatpush.msra.mxu0 %v55_v4  ;;  %125 = vmatpush.msra.mxu1 %v55_v4 }
  0x14   :  { %120 = vmatmul.msk.f32.vlgmr.msra.gmra.mxu0 %vm48_vm0, %v53_v5  ;;  %121 = vmatmul.msk.f32.vlgmr.msra.gmra.mxu1 %vm48_vm0, %v54_v6  ;;  %v51_v7 = vld [vmem:[#allocation2] sm:$0xff] }
  0x15   :  { %v52_v8 = vld [vmem:[#allocation2 + $0x8] sm:$0xff] }
  0x91   :  { %v83_v9 = vpop.f32.mrf.mxu0  ;;  %v86_v10 = vpop.f32.mrf.mxu1 }
  0x92   :  { %v89_v11 = vadd.f32 %v83_v9, %v51_v7  ;;  %v90_v12 = vadd.f32 %v86_v10, %v52_v8 }
  0x94   :  { %91 = vst.msk [vmem:[#allocation2] sm:$0xff] %vm48_vm0, %v89_v11 }
  0x95   :  { %92 = vst.msk [vmem:[#allocation2 + $0x8] sm:$0xff] %vm48_vm0, %v90_v12 }
  0x9b   :  { %v96_v13 = vld [vmem:[#allocation2] sm:$0xff] }
  0x9c   :  { %v97_v14 = vld [vmem:[#allocation2 + $0x8] sm:$0xff]  ;;  %98 = vst.msk [vmem:[#allocation8] sm:$0xff] %vm48_vm0, %v96_v13 }
  0x9d   :  { %99 = vst.msk [vmem:[#allocation8 + $0x8] sm:$0xff] %vm48_vm0, %v97_v14 }
  0x9e   :  { %112 = dma.vmem_to_hbm [thread:$0]  %s105_s1, 256, %s107_s23, [#allocation5], %s211_s17, %s211_s17, %s212_s18  }
  0x9f   :  { %208 = dma.done.wait [#allocation5], 256  }
  0xa0   :  { %209 = vsyncadd [#allocation5], 4294967040 }
  0xa1   :  { %117 = vsyncpa [#allocation4], 1 }
  0xa2   :  { %118 = vsyncpa [#allocation7], 1 }
  0xa3   :  { %119 = vsyncpa [#allocation5], 1 }

</bundles_post_ra>
